<compile_context>
chip_gen: v7x
topology: tpu7x:2x2x1
jax: 0.10.0
libtpu: 0.0.40
codegen_flags: <defaults>
</compile_context>

<pallas_src>
import functools

import jax
import jax.numpy as jnp
from jax.experimental import pallas as pl
from jax.experimental.pallas import tpu as pltpu


def encode_sample_kernel(x_ref, w1_ref, b1_ref, wh_ref, bh_ref, eps_ref, z_ref,
                         slab_ref, *, wp):
    """One halo'd row strip of one image per grid step.

    x_ref   : (Cin, Lstrip)  bf16  flattened padded rows of the strip (incl. 2-row halo)
    w1_ref  : (Ch, 9*Cin)    bf16  3x3 conv weight (taps x cin on the contracted axis)
    b1_ref  : (Ch, 1)        f32
    wh_ref  : (2*Cl, Ch)     bf16  fused [mu; logvar] 1x1 head
    bh_ref  : (2*Cl, 1)      f32
    eps_ref : (Cl, TM)       f32   pre-drawn N(0,1) noise, strip layout
    z_ref   : (Cl, TM)       f32   sampled latent (output), strip layout
    slab_ref: (9*Cin, TM)    f32   VMEM scratch for the in-kernel im2col slab
    """
    cl, tm = z_ref.shape
    cin = x_ref.shape[0]

    # In-kernel im2col: tap (dy, dx) of output lane p lives at lane p + dy*Wp + dx of the
    # flattened padded strip -> 9 static lane-shifted slices build the (9*Cin, TM) slab.
    for t in range(9):
        dy, dx = t // 3, t % 3
        off = dy * wp + dx
        slab_ref[t * cin:(t + 1) * cin, :] = x_ref[:, off:off + tm].astype(jnp.float32)

    # 3x3 conv as ONE MXU matmul with K = 9*Cin (bf16 operands, f32 accumulation).
    patches = slab_ref[...].astype(jnp.bfloat16)
    h = jnp.dot(w1_ref[...], patches, preferred_element_type=jnp.float32)
    h = jnp.maximum(h + b1_ref[...], 0.0)

    # Fused mu / log-var head: (2*Cl, Ch) @ (Ch, TM).
    head = jnp.dot(wh_ref[...], h.astype(jnp.bfloat16),
                   preferred_element_type=jnp.float32) + bh_ref[...]

    mu = head[:cl, :]
    sigma = jnp.exp(0.5 * head[cl:, :])

    # Reparameterization sampling (f32 tail, lane-dense store).
    z_ref[...] = mu + eps_ref[...] * sigma


def plan_tiling(n, cin, h, w, ch, cl, *, vmem_block_budget=4 << 20, min_steps=4):
    """Pick row-strips per image: largest strips that fit the VMEM budget while still
    giving >= min_steps grid steps (so v7x's two TensorCores both get work)."""
    wp = w + 2

    def footprint(th):
        tm = th * wp
        lstrip = (th + 2) * wp + 2
        return (2 * cin * lstrip * 2          # input block (bf16, double-buffered)
                + 9 * cin * tm * 4            # slab scratch (f32)
                + ch * tm * 4                 # h (f32)
                + 2 * cl * tm * 4             # head (f32)
                + 2 * 2 * cl * tm * 4)        # eps + z blocks (f32, double-buffered)

    divisors = [d for d in range(1, h + 1) if h % d == 0]
    feasible = [s for s in divisors if footprint(h // s) <= vmem_block_budget]
    if not feasible:
        s = h
    else:
        meeting = [s for s in feasible if n * s >= min_steps]
        s = min(meeting) if meeting else min(feasible)
    th = h // s
    return dict(num_strips=s, strip_rows=th, wp=wp, tm=th * wp,
                lstrip=(th + 2) * wp + 2)


def stage1_wrapper_forward(x_nchw, params, eps_strips, plan):
    """x: (N, Cin, H, W) f32 NCHW, eps_strips: (N*S, Cl, TM) f32 -> z: (N, Cl, H, W) f32."""
    n, cin, h, w = x_nchw.shape
    ch = params["w1"].shape[3]
    cl = params["wmu"].shape[1]
    s, th = plan["num_strips"], plan["strip_rows"]
    wp, tm, lstrip = plan["wp"], plan["tm"], plan["lstrip"]
    ns = n * s

    # ---- wrapper glue: ONE cheap pass over the small input (pad + bf16 + halo'd strips),
    #      no 9x im2col expansion in HBM. ------------------------------------------------
    xp = jnp.pad(x_nchw.astype(jnp.bfloat16), ((0, 0), (0, 0), (1, 2), (1, 1)))
    xflat = xp.reshape(n, cin, (h + 3) * wp)
    x_strips = jnp.stack(
        [xflat[:, :, i * th * wp: i * th * wp + lstrip] for i in range(s)], axis=1)
    x_strips = x_strips.reshape(ns, cin, lstrip)

    w1t = jnp.transpose(params["w1"].reshape(9 * cin, ch)).astype(jnp.bfloat16)   # (Ch, 9Cin)
    b1t = params["b1"].reshape(ch, 1).astype(jnp.float32)
    wht = jnp.concatenate([params["wmu"], params["wlv"]], axis=1).T.astype(jnp.bfloat16)
    bht = jnp.concatenate([params["bmu"], params["blv"]], axis=1).reshape(2 * cl, 1)
    bht = bht.astype(jnp.float32)

    flops = 2 * ns * tm * (9 * cin * ch + ch * 2 * cl)
    bytes_accessed = (x_strips.size * 2 + eps_strips.size * 4 + ns * cl * tm * 4
                      + w1t.size * 2 + wht.size * 2 + (ch + 2 * cl) * 4)
    per_step_vmem = (2 * cin * lstrip * 2 + 9 * cin * tm * 4 + ch * tm * 4
                     + 2 * cl * tm * 4 + 2 * 2 * cl * tm * 4)
    vmem_limit = int(min(max(4 * per_step_vmem, 16 << 20), 56 << 20))

    z_strips = pl.pallas_call(
        functools.partial(encode_sample_kernel, wp=wp),
        out_shape=jax.ShapeDtypeStruct((ns, cl, tm), jnp.float32),
        grid=(ns,),
        in_specs=[
            pl.BlockSpec((None, cin, lstrip), lambda i: (i, 0, 0)),   # halo'd strip (streamed)
            pl.BlockSpec((ch, 9 * cin), lambda i: (0, 0)),            # conv weight (resident)
            pl.BlockSpec((ch, 1), lambda i: (0, 0)),
            pl.BlockSpec((2 * cl, ch), lambda i: (0, 0)),             # fused head weight
            pl.BlockSpec((2 * cl, 1), lambda i: (0, 0)),
            pl.BlockSpec((None, cl, tm), lambda i: (i, 0, 0)),        # eps (streamed)
        ],
        out_specs=pl.BlockSpec((None, cl, tm), lambda i: (i, 0, 0)),
        scratch_shapes=[pltpu.VMEM((9 * cin, tm), jnp.float32)],
        compiler_params=pltpu.CompilerParams(
            dimension_semantics=("parallel",),
            vmem_limit_bytes=vmem_limit),
        cost_estimate=pl.CostEstimate(flops=flops,
                                      transcendentals=ns * tm * cl,
                                      bytes_accessed=bytes_accessed),
    )(x_strips, w1t, b1t, wht, bht, eps_strips)

    # Strip layout -> NCHW: unfold strips and drop the 2 pad columns per row.
    # (Pure reshape when S == 1; a consumer accepting the lane-padded slab could skip this.)
    z = z_strips.reshape(n, s, cl, th, wp)
    z = jnp.transpose(z, (0, 2, 1, 3, 4)).reshape(n, cl, h, wp)
    return z[:, :, :, :w]


def strips_to_nchw(a_strips, n, s, c, th, wp, h, w):
    a = a_strips.reshape(n, s, c, th, wp)
    a = jnp.transpose(a, (0, 2, 1, 3, 4)).reshape(n, c, h, wp)
    return a[:, :, :, :w]


def reference_forward(x_nchw, params, eps_nchw):
    """Pure-JAX NHWC reference.  Matmul operands are bf16-quantized to mirror the kernel's
    bf16 MXU inputs (accumulation stays f32), so a tight tolerance remains valid."""
    q = lambda a: a.astype(jnp.bfloat16).astype(jnp.float32)
    x = q(jnp.transpose(x_nchw, (0, 2, 3, 1)))
    n, h, w, cin = x.shape
    ch = params["w1"].shape[3]
    xpad = jnp.pad(x, ((0, 0), (1, 1), (1, 1), (0, 0)))
    w1 = q(params["w1"])
    acc = jnp.zeros((n, h, w, ch), jnp.float32)
    for dy in range(3):
        for dx in range(3):
            acc = acc + jnp.einsum("nhwc,co->nhwo",
                                   xpad[:, dy:dy + h, dx:dx + w, :], w1[dy, dx])
    hact = q(jax.nn.relu(acc + params["b1"][0]))
    mu = jnp.einsum("nhwc,co->nhwo", hact, q(params["wmu"])) + params["bmu"][0]
    lv = jnp.einsum("nhwc,co->nhwo", hact, q(params["wlv"])) + params["blv"][0]
    eps = jnp.transpose(eps_nchw, (0, 2, 3, 1))
    z = mu + eps * jnp.exp(0.5 * lv)
    return jnp.transpose(z, (0, 3, 1, 2))


def init_params(key, cin, ch, cl):
    k1, k2, k3 = jax.random.split(key, 3)
    scale1 = 1.0 / jnp.sqrt(9.0 * cin)
    scale2 = 1.0 / jnp.sqrt(float(ch))
    return {
        "w1": (scale1 * jax.random.normal(k1, (3, 3, cin, ch))).astype(jnp.float32),
        "b1": jnp.zeros((1, ch), jnp.float32),
        "wmu": (scale2 * jax.random.normal(k2, (ch, cl))).astype(jnp.float32),
        "bmu": jnp.zeros((1, cl), jnp.float32),
        "wlv": (scale2 * jax.random.normal(k3, (ch, cl))).astype(jnp.float32),
        "blv": jnp.zeros((1, cl), jnp.float32),
    }


if __name__ == "__main__":
    N, Cin, H, W = 2, 4, 16, 16   # small synthetic shapes
    Ch, Cl = 32, 4                # hidden / latent channels

    key = jax.random.PRNGKey(0)
    kx, keps, kp = jax.random.split(key, 3)

    x = jax.random.normal(kx, (N, Cin, H, W), dtype=jnp.float32)     # NCHW like PyTorch
    params = init_params(kp, Cin, Ch, Cl)

    plan = plan_tiling(N, Cin, H, W, Ch, Cl)
    # TODO(synk): PyTorch draws eps inside model.sampling (torch.randn_like); here it is drawn
    # outside (already in the kernel's lane-dense strip layout, so no transpose) to keep the
    # kernel deterministic/testable.  pltpu.prng_seed/prng_random_bits could move it in-kernel.
    eps_strips = jax.random.normal(
        keps, (N * plan["num_strips"], Cl, plan["tm"]), dtype=jnp.float32)

    z = stage1_wrapper_forward(x, params, eps_strips, plan)
    z = jax.block_until_ready(z)

    eps_nchw = strips_to_nchw(eps_strips, N, plan["num_strips"], Cl,
                              plan["strip_rows"], plan["wp"], H, W)
    z_ref = reference_forward(x, params, eps_nchw)
    assert z.shape == (N, Cl, H, W)
    assert jnp.allclose(z, z_ref, rtol=2e-3, atol=2e-3), "kernel mismatch vs reference"

    print("KERNEL_OK")
</pallas_src>

<mosaic_0001>
module attributes {stable_mosaic.version = 11 : i64} {
  func.func @encode_sample_kernel(%arg0: i32, %arg1: memref<1x4x182xbf16, #tpu.memory_space<vmem>>, %arg2: memref<32x36xbf16, #tpu.memory_space<vmem>>, %arg3: memref<32x1xf32, #tpu.memory_space<vmem>>, %arg4: memref<8x32xbf16, #tpu.memory_space<vmem>>, %arg5: memref<8x1xf32, #tpu.memory_space<vmem>>, %arg6: memref<1x4x144xf32, #tpu.memory_space<vmem>>, %arg7: memref<1x4x144xf32, #tpu.memory_space<vmem>>, %arg8: memref<36x144xf32, #tpu.memory_space<vmem>>) attributes {dimension_semantics = [#tpu.dimension_semantics<parallel>], iteration_bounds = array<i64: 4>, scalar_prefetch = 0 : i64, scratch_operands = 1 : i64, tpu.core_type = #tpu.core_type<tc>, window_params = [{transform_indices = @transform_0, window_bounds = array<i64: 1, 4, 182>}, {pipeline_mode = #tpu.pipeline_mode<synchronous>, transform_indices = @transform_1, window_bounds = array<i64: 32, 36>}, {pipeline_mode = #tpu.pipeline_mode<synchronous>, transform_indices = @transform_2, window_bounds = array<i64: 32, 1>}, {pipeline_mode = #tpu.pipeline_mode<synchronous>, transform_indices = @transform_3, window_bounds = array<i64: 8, 32>}, {pipeline_mode = #tpu.pipeline_mode<synchronous>, transform_indices = @transform_4, window_bounds = array<i64: 8, 1>}, {transform_indices = @transform_5, window_bounds = array<i64: 1, 4, 144>}, {transform_indices = @transform_6, window_bounds = array<i64: 1, 4, 144>}]} {
    %c0 = arith.constant 0 : index
    %c0_0 = arith.constant 0 : index
    %c0_1 = arith.constant 0 : index
    %0 = vector.load %arg1[%c0, %c0_0, %c0_1] : memref<1x4x182xbf16, #tpu.memory_space<vmem>>, vector<1x4x144xbf16>
    %1 = vector.shape_cast %0 : vector<1x4x144xbf16> to vector<4x144xbf16>
    %2 = arith.extf %1 : vector<4x144xbf16> to vector<4x144xf32>
    %c0_2 = arith.constant 0 : index
    %c0_3 = arith.constant 0 : index
    %3 = vector.load %arg8[%c0_2, %c0_3] : memref<36x144xf32, #tpu.memory_space<vmem>>, vector<4x144xf32>
    tpu.vector_store %arg8[%c0_2, %c0_3], %2 {strides = array<i32>} : memref<36x144xf32, #tpu.memory_space<vmem>>, vector<4x144xf32>,
    %c0_4 = arith.constant 0 : index
    %c0_5 = arith.constant 0 : index
    %c1 = arith.constant 1 : index
    %4 = vector.load %arg1[%c0_4, %c0_5, %c1] : memref<1x4x182xbf16, #tpu.memory_space<vmem>>, vector<1x4x144xbf16>
    %5 = vector.shape_cast %4 : vector<1x4x144xbf16> to vector<4x144xbf16>
    %6 = arith.extf %5 : vector<4x144xbf16> to vector<4x144xf32>
    %c4 = arith.constant 4 : index
    %c0_6 = arith.constant 0 : index
    %7 = vector.load %arg8[%c4, %c0_6] : memref<36x144xf32, #tpu.memory_space<vmem>>, vector<4x144xf32>
    tpu.vector_store %arg8[%c4, %c0_6], %6 {strides = array<i32>} : memref<36x144xf32, #tpu.memory_space<vmem>>, vector<4x144xf32>,
    %c0_7 = arith.constant 0 : index
    %c0_8 = arith.constant 0 : index
    %c2 = arith.constant 2 : index
    %8 = vector.load %arg1[%c0_7, %c0_8, %c2] : memref<1x4x182xbf16, #tpu.memory_space<vmem>>, vector<1x4x144xbf16>
    %9 = vector.shape_cast %8 : vector<1x4x144xbf16> to vector<4x144xbf16>
    %10 = arith.extf %9 : vector<4x144xbf16> to vector<4x144xf32>
    %c8 = arith.constant 8 : index
    %c0_9 = arith.constant 0 : index
    %11 = vector.load %arg8[%c8, %c0_9] : memref<36x144xf32, #tpu.memory_space<vmem>>, vector<4x144xf32>
    tpu.vector_store %arg8[%c8, %c0_9], %10 {strides = array<i32>} : memref<36x144xf32, #tpu.memory_space<vmem>>, vector<4x144xf32>,
    %c0_10 = arith.constant 0 : index
    %c0_11 = arith.constant 0 : index
    %c18 = arith.constant 18 : index
    %12 = vector.load %arg1[%c0_10, %c0_11, %c18] : memref<1x4x182xbf16, #tpu.memory_space<vmem>>, vector<1x4x144xbf16>
    %13 = vector.shape_cast %12 : vector<1x4x144xbf16> to vector<4x144xbf16>
    %14 = arith.extf %13 : vector<4x144xbf16> to vector<4x144xf32>
    %c12 = arith.constant 12 : index
    %c0_12 = arith.constant 0 : index
    %15 = vector.load %arg8[%c12, %c0_12] : memref<36x144xf32, #tpu.memory_space<vmem>>, vector<4x144xf32>
    tpu.vector_store %arg8[%c12, %c0_12], %14 {strides = array<i32>} : memref<36x144xf32, #tpu.memory_space<vmem>>, vector<4x144xf32>,
    %c0_13 = arith.constant 0 : index
    %c0_14 = arith.constant 0 : index
    %c19 = arith.constant 19 : index
    %16 = vector.load %arg1[%c0_13, %c0_14, %c19] : memref<1x4x182xbf16, #tpu.memory_space<vmem>>, vector<1x4x144xbf16>
    %17 = vector.shape_cast %16 : vector<1x4x144xbf16> to vector<4x144xbf16>
    %18 = arith.extf %17 : vector<4x144xbf16> to vector<4x144xf32>
    %c16 = arith.constant 16 : index
    %c0_15 = arith.constant 0 : index
    %19 = vector.load %arg8[%c16, %c0_15] : memref<36x144xf32, #tpu.memory_space<vmem>>, vector<4x144xf32>
    tpu.vector_store %arg8[%c16, %c0_15], %18 {strides = array<i32>} : memref<36x144xf32, #tpu.memory_space<vmem>>, vector<4x144xf32>,
    %c0_16 = arith.constant 0 : index
    %c0_17 = arith.constant 0 : index
    %c20 = arith.constant 20 : index
    %20 = vector.load %arg1[%c0_16, %c0_17, %c20] : memref<1x4x182xbf16, #tpu.memory_space<vmem>>, vector<1x4x144xbf16>
    %21 = vector.shape_cast %20 : vector<1x4x144xbf16> to vector<4x144xbf16>
    %22 = arith.extf %21 : vector<4x144xbf16> to vector<4x144xf32>
    %c20_18 = arith.constant 20 : index
    %c0_19 = arith.constant 0 : index
    %23 = vector.load %arg8[%c20_18, %c0_19] : memref<36x144xf32, #tpu.memory_space<vmem>>, vector<4x144xf32>
    tpu.vector_store %arg8[%c20_18, %c0_19], %22 {strides = array<i32>} : memref<36x144xf32, #tpu.memory_space<vmem>>, vector<4x144xf32>,
    %c0_20 = arith.constant 0 : index
    %c0_21 = arith.constant 0 : index
    %c36 = arith.constant 36 : index
    %24 = vector.load %arg1[%c0_20, %c0_21, %c36] : memref<1x4x182xbf16, #tpu.memory_space<vmem>>, vector<1x4x144xbf16>
    %25 = vector.shape_cast %24 : vector<1x4x144xbf16> to vector<4x144xbf16>
    %26 = arith.extf %25 : vector<4x144xbf16> to vector<4x144xf32>
    %c24 = arith.constant 24 : index
    %c0_22 = arith.constant 0 : index
    %27 = vector.load %arg8[%c24, %c0_22] : memref<36x144xf32, #tpu.memory_space<vmem>>, vector<4x144xf32>
    tpu.vector_store %arg8[%c24, %c0_22], %26 {strides = array<i32>} : memref<36x144xf32, #tpu.memory_space<vmem>>, vector<4x144xf32>,
    %c0_23 = arith.constant 0 : index
    %c0_24 = arith.constant 0 : index
    %c37 = arith.constant 37 : index
    %28 = vector.load %arg1[%c0_23, %c0_24, %c37] : memref<1x4x182xbf16, #tpu.memory_space<vmem>>, vector<1x4x144xbf16>
    %29 = vector.shape_cast %28 : vector<1x4x144xbf16> to vector<4x144xbf16>
    %30 = arith.extf %29 : vector<4x144xbf16> to vector<4x144xf32>
    %c28 = arith.constant 28 : index
    %c0_25 = arith.constant 0 : index
    %31 = vector.load %arg8[%c28, %c0_25] : memref<36x144xf32, #tpu.memory_space<vmem>>, vector<4x144xf32>
    tpu.vector_store %arg8[%c28, %c0_25], %30 {strides = array<i32>} : memref<36x144xf32, #tpu.memory_space<vmem>>, vector<4x144xf32>,
    %c0_26 = arith.constant 0 : index
    %c0_27 = arith.constant 0 : index
    %c38 = arith.constant 38 : index
    %32 = vector.load %arg1[%c0_26, %c0_27, %c38] : memref<1x4x182xbf16, #tpu.memory_space<vmem>>, vector<1x4x144xbf16>
    %33 = vector.shape_cast %32 : vector<1x4x144xbf16> to vector<4x144xbf16>
    %34 = arith.extf %33 : vector<4x144xbf16> to vector<4x144xf32>
    %c32 = arith.constant 32 : index
    %c0_28 = arith.constant 0 : index
    %35 = vector.load %arg8[%c32, %c0_28] : memref<36x144xf32, #tpu.memory_space<vmem>>, vector<4x144xf32>
    tpu.vector_store %arg8[%c32, %c0_28], %34 {strides = array<i32>} : memref<36x144xf32, #tpu.memory_space<vmem>>, vector<4x144xf32>,
    %c0_29 = arith.constant 0 : index
    %c0_30 = arith.constant 0 : index
    %36 = vector.load %arg8[%c0_29, %c0_30] : memref<36x144xf32, #tpu.memory_space<vmem>>, vector<36x144xf32>
    %37 = arith.truncf %36 : vector<36x144xf32> to vector<36x144xbf16>
    %c0_31 = arith.constant 0 : index
    %c0_32 = arith.constant 0 : index
    %38 = vector.load %arg2[%c0_31, %c0_32] : memref<32x36xbf16, #tpu.memory_space<vmem>>, vector<32x36xbf16>
    %cst = arith.constant dense<0.000000e+00> : vector<32x144xf32>
    %39 = tpu.matmul %38, %37, %cst {dimension_numbers = #tpu.dot_dimension_numbers<[1], [0], [0], [1], [0, 0, 1, 1], [], []>} : vector<32x36xbf16>, vector<36x144xbf16>, vector<32x144xf32> -> vector<32x144xf32>
    %c0_33 = arith.constant 0 : index
    %c0_34 = arith.constant 0 : index
    %40 = vector.load %arg3[%c0_33, %c0_34] : memref<32x1xf32, #tpu.memory_space<vmem>>, vector<32x1xf32>
    %41 = vector.broadcast %40 : vector<32x1xf32> to vector<32x144xf32>
    %42 = arith.addf %39, %41 : vector<32x144xf32>
    %cst_35 = arith.constant 0.000000e+00 : f32
    %43 = vector.broadcast %cst_35 : f32 to vector<32x144xf32>
    %44 = arith.maximumf %42, %43 : vector<32x144xf32>
    %c0_36 = arith.constant 0 : index
    %c0_37 = arith.constant 0 : index
    %45 = vector.load %arg4[%c0_36, %c0_37] : memref<8x32xbf16, #tpu.memory_space<vmem>>, vector<8x32xbf16>
    %46 = arith.truncf %44 : vector<32x144xf32> to vector<32x144xbf16>
    %cst_38 = arith.constant dense<0.000000e+00> : vector<8x144xf32>
    %47 = tpu.matmul %45, %46, %cst_38 {dimension_numbers = #tpu.dot_dimension_numbers<[1], [0], [0], [1], [0, 0, 1, 1], [], []>} : vector<8x32xbf16>, vector<32x144xbf16>, vector<8x144xf32> -> vector<8x144xf32>
    %c0_39 = arith.constant 0 : index
    %c0_40 = arith.constant 0 : index
    %48 = vector.load %arg5[%c0_39, %c0_40] : memref<8x1xf32, #tpu.memory_space<vmem>>, vector<8x1xf32>
    %49 = vector.broadcast %48 : vector<8x1xf32> to vector<8x144xf32>
    %50 = arith.addf %47, %49 : vector<8x144xf32>
    %51 = vector.extract_strided_slice %50 {offsets = [0, 0], sizes = [4, 144], strides = [1, 1]} : vector<8x144xf32> to vector<4x144xf32>
    %52 = vector.extract_strided_slice %50 {offsets = [4, 0], sizes = [4, 144], strides = [1, 1]} : vector<8x144xf32> to vector<4x144xf32>
    %cst_41 = arith.constant 5.000000e-01 : f32
    %53 = vector.broadcast %cst_41 : f32 to vector<4x144xf32>
    %54 = arith.mulf %53, %52 : vector<4x144xf32>
    %55 = math.exp %54 : vector<4x144xf32>
    %c0_42 = arith.constant 0 : index
    %c0_43 = arith.constant 0 : index
    %c0_44 = arith.constant 0 : index
    %56 = vector.load %arg6[%c0_42, %c0_43, %c0_44] : memref<1x4x144xf32, #tpu.memory_space<vmem>>, vector<1x4x144xf32>
    %57 = vector.shape_cast %56 : vector<1x4x144xf32> to vector<4x144xf32>
    %58 = arith.mulf %57, %55 : vector<4x144xf32>
    %59 = arith.addf %51, %58 : vector<4x144xf32>
    %c0_45 = arith.constant 0 : index
    %c0_46 = arith.constant 0 : index
    %c0_47 = arith.constant 0 : index
    %60 = vector.load %arg7[%c0_45, %c0_46, %c0_47] : memref<1x4x144xf32, #tpu.memory_space<vmem>>, vector<1x4x144xf32>
    %61 = vector.shape_cast %60 : vector<1x4x144xf32> to vector<4x144xf32>
    %62 = vector.shape_cast %59 : vector<4x144xf32> to vector<1x4x144xf32>
    tpu.vector_store %arg7[%c0_45, %c0_46, %c0_47], %62 {strides = array<i32>} : memref<1x4x144xf32, #tpu.memory_space<vmem>>, vector<1x4x144xf32>,
    return
  }
  func.func @transform_0(%arg0: i32) -> (i32, i32, i32) {
    %c0_i32 = arith.constant 0 : i32
    %c0_i32_0 = arith.constant 0 : i32
    %c0_i32_1 = arith.constant 0 : i32
    return %arg0, %c0_i32, %c0_i32_0 : i32, i32, i32
  }
  func.func @transform_1(%arg0: i32) -> (i32, i32) {
    %c0_i32 = arith.constant 0 : i32
    %c0_i32_0 = arith.constant 0 : i32
    %c0_i32_1 = arith.constant 0 : i32
    return %c0_i32, %c0_i32_0 : i32, i32
  }
  func.func @transform_2(%arg0: i32) -> (i32, i32) {
    %c0_i32 = arith.constant 0 : i32
    %c0_i32_0 = arith.constant 0 : i32
    %c0_i32_1 = arith.constant 0 : i32
    return %c0_i32, %c0_i32_0 : i32, i32
  }
  func.func @transform_3(%arg0: i32) -> (i32, i32) {
    %c0_i32 = arith.constant 0 : i32
    %c0_i32_0 = arith.constant 0 : i32
    %c0_i32_1 = arith.constant 0 : i32
    return %c0_i32, %c0_i32_0 : i32, i32
  }
  func.func @transform_4(%arg0: i32) -> (i32, i32) {
    %c0_i32 = arith.constant 0 : i32
    %c0_i32_0 = arith.constant 0 : i32
    %c0_i32_1 = arith.constant 0 : i32
    return %c0_i32, %c0_i32_0 : i32, i32
  }
  func.func @transform_5(%arg0: i32) -> (i32, i32, i32) {
    %c0_i32 = arith.constant 0 : i32
    %c0_i32_0 = arith.constant 0 : i32
    %c0_i32_1 = arith.constant 0 : i32
    return %arg0, %c0_i32, %c0_i32_0 : i32, i32, i32
  }
  func.func @transform_6(%arg0: i32) -> (i32, i32, i32) {
    %c0_i32 = arith.constant 0 : i32
    %c0_i32_0 = arith.constant 0 : i32
    %c0_i32_1 = arith.constant 0 : i32
    return %arg0, %c0_i32, %c0_i32_0 : i32, i32, i32
  }
}

</mosaic_0001>

<bundles_post_ra>
// kernel: tpu_custom_call.1
= control target key start
LH: loop header
LB: loop body
LE: loop exit
PB: predicated region body
PF: predicated region fallthrough
CT: control target
= control target key end

     0   :  { %11 = vsyncpa [#allocation4], 0  ;;  %s1167_s0 = inlined_call_operand.vmem [shape: bf16[4,4,182], index: 0, kind: input, shape index: {}]   ;;  %s1168_s1 = inlined_call_operand.hbm [shape: bf16[32,36], index: 1, kind: input, shape index: {}]   ;;  %s1169_s2 = inlined_call_operand.vmem [shape: f32[32,1], index: 2, kind: input, shape index: {}]   ;;  %s1170_s3 = inlined_call_operand.vmem [shape: bf16[8,32], index: 3, kind: input, shape index: {}]   ;;  %s1171_s4 = inlined_call_operand.vmem [shape: f32[8,1], index: 4, kind: input, shape index: {}]   ;;  %s1172_s5 = inlined_call_operand.vmem [shape: f32[4,4,144], index: 5, kind: input, shape index: {}]   ;;  %s1173_s6 = inlined_call_operand.hbm [shape: f32[4,4,144], index: 6, kind: output, shape index: {}]  }
   0x1   :  { %12 = vsyncpa [#allocation5], 0 }
   0x2   :  { %14 = vsyncpa [#allocation5 + $0x1], 0  ;;  %s992_s21 = smov 0   ;;  %s994_s22 = smov 0  }
   0x3   :  { %s996_s23 = smov 0   ;;  %s998_s24 = smov 0  }
   0x4 LB: > { %s1013_s25 = sadd.s32 4294967295, %s942_s24   ;;  %s714_s26 = sadd.s32 4294967294, %s942_s24   ;;  %s942_s24 = sphi %s998_s24, %s1189_s24   ;;  %s938_s23 = sphi %s996_s23, %s1188_s23   ;;  %s934_s22 = sphi %s994_s22, %s1187_s22   ;;  %s930_s21 = sphi %s992_s21, %s1186_s21  }
   0x5   : > { %s1017_s27 = sadd.s32 1, %s942_s24   ;;  %s163_s28 = sadd.s32 1, %s938_s23 }
   0x6   : > { %s160_s29 = ssub.s32 %s942_s24, %s1017_s27  ;;  %p173_p0 = scmp.ne.s32.totalorder %s938_s23, %s934_s22 }
   0x7   : > { %p161_p1 = scmp.eq.s32.totalorder %s160_s29, 0  ;;  %p174_p2 = scmp.eq.s32.totalorder %s1013_s25, 3 }
   0x8   : > { %p179_p3 = scmp.ne.s32.totalorder %s934_s22, %s930_s21  ;;  %p180_p4 = scmp.eq.s32.totalorder %s714_s26, 3 }
   0x9   : > { %s1028_s30 = scalar_select %p161_p1, %s938_s23, %s163_s28  }
   0xa   : > { %p1030_p5 = por %p174_p2, %p173_p0  ;;  %p1034_p6 = por %p180_p4, %p179_p3 }
   0xb   : > { %p715_p7 = scmp.ge.s32.totalorder %s942_s24, 1  ;;  %p187_p8 = scmp.lt.s32.totalorder %s942_s24, 5 }
   0xc   : > { %s1177_s7 = scalar_select %p1030_p5, 1, 0 }
   0xd   : > { %s1178_s8 = scalar_select %p1034_p6, 1, 0 }
   0xe   : > { %p1174_p9 = scmp.eq.s32.totalorder %s1013_s25, 0  ;;  %p1041_p10 = pnand %p715_p7, %p187_p8 }
   0xf   : > { %s944_s10 = smov [#allocation3]   ;;  %s848_s15 = scalar_lea.hbm %s1168_s1, 256 }
  0x10   : > { %s1179_s9 = scalar_select %p1041_p10, 1, 0 }
  0x11   : > { %s199_s11 = sshll.u32 %s944_s10, 4  ;;  %p745_p11 = pneg %p1041_p10  ;;  %s200_s11 = int_to_ptr.vmem [resolvable:$true] %s199_s11 }
  0x12   : > { %p849_p13 = scmp.ne.s32.totalorder %s1168_s1, %s848_s15  ;;  %p855_p3 = scmp.lt.u32.totalorder %s848_s15, %s1168_s1 }
  0x13   : > { %p1049_p12 = pnand %p1174_p9, %p745_p11 }
  0x15   : > { %p850_p0 = pneg %p1049_p12 }
  0x17   : > { %p851_p1 = pnand %p850_p0, %p849_p13 }
  0x19   : > { %p852_p2 = pneg %p851_p1 }
  0x1b   : > { %p857_p4 = pnand %p855_p3, %p852_p2 }
  0x1d   : > { %860 = shalt.err (!%p857_p4)
}
  0x1e   : > { %s861_s20 = scalar_lea.vmem %s200_s11, 256  ;;  %p869_p9 = scmp.lt.s32.totalorder %s200_s11, %s200_s11 }
  0x1f   : > { %p862_p7 = scmp.ne.s32.totalorder %s200_s11, %s861_s20  ;;  %p870_p6 = scmp.lt.s32.totalorder %s861_s20, %s861_s20 }
  0x21   : > { %p864_p8 = pnand %p862_p7, %p850_p0  ;;  %p871_p5 = por %p870_p6, %p869_p9 }
  0x23   : > { %p865_p11 = pneg %p864_p8 }
  0x25   : > { %p872_p10 = pnand %p871_p5, %p865_p11 }
  0x27   : > { %875 = shalt.err (!%p872_p10)
}
  0x28   : > { %s945_s26 = smov 64   ;;  %s946_s28 = smov 4  }
  0x29   : > { %748 = dma.hbm_to_vmem [thread:$0]  (!%p1049_p12), %s1168_s1, 256, %s200_s11, [#allocation4], %s945_s26, %s945_s26, %s946_s28  }
  0x2a   : > { %p1181_p13 = scmp.ne.s32.totalorder %s1179_s9, 0 }
  0x2b   : > { %p1182_p1 = scmp.eq.s32.totalorder (!%p1181_p13), %s1013_s25, 0 }
  0x2c   : > { %240 = sbr.rel (%p1181_p13) target bundleno = 699 (0x2bb), region = 44 }
  0x33   : > { %921 = dma.done.wait (%p1182_p1), [#allocation4], 256   ;;  %p1183_p0 = pmov %p1182_p1 }
  0x34   : > { %p275_p5 = scmp.lt.s32.totalorder %s1013_s25, 3  ;;  %s947_s9 = smov 127   ;;  %vm292_vm0 = vcmask 125952   ;;  %v955_v35 = vmov 0   ;;  %v428_v36 = vld [vmem:[%s1169_s2 + $0x8] sm:$0xff]  ;;  %v427_v37 = vld [vmem:[%s1169_s2] sm:$0xff] }
  0x35   : > { %923 = vsyncadd (%p1183_p0), [#allocation4], 4294967040  ;;  %s948_s16 = smov 110   ;;  %s949_s17 = smov 126   ;;  %507 = vmatprep.mubr.bf16.mxu0 %v955_v35  ;;  %841 = vset.pattern.permute.xlu1 %v955_v35  ;;  %v429_v38 = vld [vmem:[%s1169_s2 + $0x10] sm:$0xff]  ;;  %v430_v39 = vld [vmem:[%s1169_s2 + $0x18] sm:$0xff] }
  0x36   : > { %s1077_s13 = scalar_select %p275_p5, %s1013_s25, 3  ;;  %840 = vset.pattern.permute.xlu0 %v955_v35  ;;  %583 = vmatprep.mubr.bf16.mxu1 %v955_v35  ;;  %v541_v40 = vld [vmem:[%s1171_s4] sm:$0xff]  ;;  %vm302_vm1 = vcmask 1039360   ;;  %vm307_vm2 = vcmask 130052   ;;  %vm331_vm3 = vcmask 900096   ;;  %vm317_vm4 = vcmask 1031168  }
  0x37   : > { %s950_s18 = smov 109   ;;  %s951_s19 = smov 108   ;;  %vm345_vm5 = vcmask 891904   ;;  %vm359_vm6 = vcmask 883712   ;;  %vm373_vm7 = vcmask 752640   ;;  %vm387_vm8 = vcmask 744448  }
  0x38   : > { %s736_s12 = sshll.u32 %s1077_s13, 2  ;;  %s952_s20 = smov 92   ;;  %vm401_vm9 = vcmask 736256   ;;  %vm468_vm10 = vcmask 1041408   ;;  %vm461_vm11 = vcmask 293888   ;;  %vm547_vm12 = vcmask 261120  }
  0x39   : > { %s279_s11 = scalar_lea.vmem %s1167_s0, %s736_s12  ;;  %s953_s26 = smov 91   ;;  %vm613_vm13 = vcmask 1043456  }
  0x3a   : > { %v294_v0 = vld [vmem:[%s279_s11] sm:$0xf]  ;;  %s954_s28 = smov 90   ;;  %s272_s12 = sand.u32 1, %s934_s22   ;;  %vm614_vm14 = vmor %vm307_vm2, %vm613_vm13 }
  0x3b   : > { %v323_v1 = vld [vmem:[%s279_s11] sm:$0xf]  ;;  %v295_v3 = vunpack.c.l.bf16 %v294_v0  ;;  %s720_s14 = sshll.u32 %s272_s12, 3  ;;  %s738_s15 = sshll.u32 %s1013_s25, 7 }
  0x3c   : > { %v309_v2 = vld [vmem:[%s279_s11] sm:$0xf]  ;;  %v324_v4 = vunpack.c.l.bf16 %v323_v1  ;;  %p1184_p9 = scmp.ne.s32.totalorder %s1177_s7, 0  ;;  %s956_s25 = smov [#allocation6]  }
  0x3d   : > { %v310_v5 = vunpack.c.l.bf16 %v309_v2  ;;  %v337_v6 = vld [vmem:[%s279_s11] sm:$0xf]  ;;  %v297_v13 = vcombine.low %v295_v3, %v295_v3 }
  0x3e   : > { %v351_v7 = vld [vmem:[%s279_s11] sm:$0xf]  ;;  %v338_v9 = vunpack.c.l.bf16 %v337_v6  ;;  %v326_v14 = vcombine.low %v324_v4, %v324_v4 }
  0x3f   : > { %v365_v8 = vld [vmem:[%s279_s11] sm:$0xf]  ;;  %v352_v10 = vunpack.c.l.bf16 %v351_v7  ;;  %v312_v15 = vcombine.high %v310_v5, %v310_v5  ;;  %v800_v19 = vpack.i.bf16 %v295_v3, %v297_v13 }
  0x40   : > { %v366_v11 = vunpack.c.l.bf16 %v365_v8  ;;  %v379_v12 = vld [vmem:[%s279_s11] sm:$0xf]  ;;  %v340_v16 = vcombine.high %v338_v9, %v338_v9  ;;  %v810_v20 = vpack.i.bf16 %v324_v4, %v326_v14 }
  0x41   : > { %v393_v17 = vld [vmem:[%s279_s11] sm:$0xf]  ;;  %v354_v21 = vcombine.low %v352_v10, %v352_v10  ;;  %v380_v23 = vunpack.c.l.bf16 %v379_v12  ;;  %801 = vrot.lane.b32.xlu0 %v800_v19, %s947_s9  ;;  %v805_v24 = vpack.i.bf16 %v312_v15, %v310_v5 }
  0x42   : > { %v286_v18 = vld [vmem:[%s279_s11] sm:$0xf]  ;;  %v368_v22 = vcombine.high %v366_v11, %v366_v11  ;;  %811 = vrot.lane.b32.xlu1 %v810_v20, %s948_s16  ;;  %v815_v25 = vpack.i.bf16 %v340_v16, %v338_v9  ;;  %v394_v26 = vunpack.c.l.bf16 %v393_v17  ;;  %s274_s11 = scalar_lea.vmem [#allocation6], %s720_s14 }
  0x43   : > { %v287_v27 = vunpack.c.l.bf16 %v286_v18  ;;  %v382_v29 = vcombine.low %v380_v23, %v380_v23  ;;  %v820_v30 = vpack.i.bf16 %v352_v10, %v354_v21  ;;  %s631_s9 = sshll.u32 %s274_s11, 4  ;;  %s1127_s9 = int_to_ptr.vmem [resolvable:$true] %s631_s9 }
  0x44   : > { %v825_v31 = vpack.i.bf16 %v368_v22, %v366_v11  ;;  %v396_v32 = vcombine.high %v394_v26, %v394_v26 }
  0x45   : > { %v289_v28 = vcombine.high %v287_v27, %v287_v27  ;;  %291 = vst [vmem:[#allocation2] sm:$0xf] %v287_v27  ;;  %806 = vrot.lane.b32.xlu0 %v805_v24, %s949_s17  ;;  %v830_v33 = vpack.i.bf16 %v380_v23, %v382_v29  ;;  %v843_v27 = vld [vmem:[#allocation3 + $0x8] sm:$0xff]   ;;  %s1125_s17 = scalar_lea.hbm %s1173_s6, %s738_s15 }
  0x46   : > { %816 = vrot.lane.b32.xlu1 %v815_v25, %s950_s18  ;;  %v835_v34 = vpack.i.bf16 %v396_v32, %v394_v26  ;;  %v842_v26 = vld [vmem:[#allocation3] sm:$0xff]   ;;  %s617_s18 = scalar_lea.sflag [#allocation5], %s272_s12 }
  0x47   : > { %293 = vst.msk [vmem:[#allocation2 + $0x8] sm:$0xf] %vm292_vm0, %v289_v28 }
  0x49   : > { %821 = vrot.lane.b32.xlu0 %v820_v30, %s951_s19  ;;  %s876_s19 = scalar_lea.vmem %s1127_s9, 128 }
  0x4a   : > { %826 = vrot.lane.b32.xlu1 %v825_v31, %s952_s20  ;;  %p877_p6 = scmp.ne.s32.totalorder %s1127_s9, %s876_s19  ;;  %s880_s20 = sshll.u32 %s956_s25, 4  ;;  %s881_s20 = int_to_ptr.vmem [resolvable:$false] %s880_s20 }
  0x4b   : > { %p883_p2 = scmp.lt.s32.totalorder %s1127_s9, %s881_s20 }
  0x4c   : > { %p878_p10 = pnand %p877_p6, %p1184_p9 }
  0x4d   : > { %831 = vrot.lane.b32.xlu0 %v830_v33, %s953_s26  ;;  %s737_s26 = sshll.u32 %s1077_s13, 3 }
  0x4e   : > { %836 = vrot.lane.b32.xlu1 %v835_v34, %s954_s28  ;;  %s284_s10 = scalar_lea.vmem %s1172_s5, %s737_s26  ;;  %p879_p12 = pneg %p878_p10 }
  0x4f   : > { %s882_s26 = scalar_lea.vmem %s881_s20, 256 }
  0x50   : > { %p884_p3 = scmp.lt.s32.totalorder %s882_s26, %s876_s19 }
  0x51   : > { %433 = vperm.xlu0 %840, %v427_v37  }
  0x52   : > { %438 = vperm.xlu1 %841, %v428_v36   ;;  %p885_p4 = por %p884_p3, %p883_p2 }
  0x54   : > { %p886_p7 = pnand %p885_p4, %p879_p12 }
  0x55   : > { %448 = vperm.xlu0 %840, %v430_v39  }
  0x56   : > { %443 = vperm.xlu1 %841, %v429_v38  }
  0x5a   : > { %544 = vperm.xlu1 %841, %v541_v40  }
  0xb3   : > { %v802_v41 = vpop.permute.xlu0 %801 }
  0xb4   : > { %v812_v42 = vpop.permute.xlu1 %811  ;;  %v804_v43 = vunpack.i.h.bf16 %v802_v41  ;;  %v803_v44 = vunpack.i.l.bf16 %v802_v41 }
  0xb5   : > { %v814_v45 = vunpack.i.h.bf16 %v812_v42  ;;  %v813_v46 = vunpack.i.l.bf16 %v812_v42 }
  0xb6   : > { %308 = vst.msk [vmem:[#allocation2 + $0x8] sm:$0xf0] %vm307_vm2, %v804_v43  ;;  %v303_v47 = vsel %vm302_vm1, %v803_v44, %v804_v43 }
  0xb7   : > { %336 = vst.msk [vmem:[#allocation2 + $0x18] sm:$0xf0] %vm307_vm2, %v814_v45  ;;  %v332_v48 = vsel %vm331_vm3, %v813_v46, %v814_v45  ;;  %306 = vst [vmem:[#allocation2] sm:$0xf0] %v303_v47  ;;  %v807_v49 = vpop.permute.xlu0 %806 }
  0xb8   : > { %335 = vst [vmem:[#allocation2 + $0x10] sm:$0xf0] %v332_v48  ;;  %v817_v50 = vpop.permute.xlu1 %816  ;;  %v809_v51 = vunpack.i.h.bf16 %v807_v49  ;;  %v808_v52 = vunpack.i.l.bf16 %v807_v49 }
  0xb9   : > { %v819_v53 = vunpack.i.h.bf16 %v817_v50  ;;  %v818_v54 = vunpack.i.l.bf16 %v817_v50 }
  0xba   : > { %322 = vst.msk [vmem:[#allocation2 + $0x18] sm:$0xf] %vm292_vm0, %v809_v51  ;;  %v318_v55 = vsel %vm317_vm4, %v808_v52, %v809_v51 }
  0xbb   : > { %350 = vst.msk [vmem:[#allocation2 + $0x28] sm:$0xf] %vm292_vm0, %v819_v53  ;;  %v346_v56 = vsel %vm345_vm5, %v818_v54, %v819_v53  ;;  %321 = vst [vmem:[#allocation2 + $0x10] sm:$0xf] %v318_v55  ;;  %v822_v57 = vpop.permute.xlu0 %821 }
  0xbc   : > { %349 = vst [vmem:[#allocation2 + $0x20] sm:$0xf] %v346_v56  ;;  %v827_v58 = vpop.permute.xlu1 %826  ;;  %v824_v59 = vunpack.i.h.bf16 %v822_v57  ;;  %v823_v60 = vunpack.i.l.bf16 %v822_v57 }
  0xbd   : > { %v829_v61 = vunpack.i.h.bf16 %v827_v58  ;;  %v828_v62 = vunpack.i.l.bf16 %v827_v58  ;;  %v408_v7 = vld [vmem:[#allocation2 + $0x8] sm:$0xff] }
  0xbe   : > { %364 = vst.msk [vmem:[#allocation2 + $0x28] sm:$0xf0] %vm307_vm2, %v824_v59  ;;  %v360_v63 = vsel %vm359_vm6, %v823_v60, %v824_v59  ;;  %v407_v12 = vld [vmem:[#allocation2] sm:$0xff] }
  0xbf   : > { %378 = vst.msk [vmem:[#allocation2 + $0x38] sm:$0xf] %vm292_vm0, %v829_v61  ;;  %v374_v0 = vsel %vm373_vm7, %v828_v62, %v829_v61  ;;  %363 = vst [vmem:[#allocation2 + $0x20] sm:$0xf0] %v360_v63  ;;  %v832_v1 = vpop.permute.xlu0 %831  ;;  %v536_v60 = vld [vmem:[%s1170_s3] sm:$0xf] }
  0xc0   : > { %377 = vst [vmem:[#allocation2 + $0x30] sm:$0xf] %v374_v0  ;;  %v837_v2 = vpop.permute.xlu1 %836  ;;  %v834_v3 = vunpack.i.h.bf16 %v832_v1  ;;  %v833_v4 = vunpack.i.l.bf16 %v832_v1 }
  0xc1   : > { %v839_v5 = vunpack.i.h.bf16 %v837_v2  ;;  %v838_v6 = vunpack.i.l.bf16 %v837_v2  ;;  %v410_v8 = vld [vmem:[#allocation2 + $0x18] sm:$0xff] }
  0xc2   : > { %392 = vst.msk [vmem:[#allocation2 + $0x38] sm:$0xf0] %vm307_vm2, %v834_v3  ;;  %v388_v9 = vsel %vm387_vm8, %v833_v4, %v834_v3  ;;  %v418_v11 = vpack.c.bf16 %v410_v8, %v408_v7  ;;  %v409_v13 = vld [vmem:[#allocation2 + $0x10] sm:$0xff] }
  0xc3   : > { %406 = vst.msk [vmem:[#allocation2 + $0x48] sm:$0xf] %vm292_vm0, %v839_v5  ;;  %v402_v10 = vsel %vm401_vm9, %v838_v6, %v839_v5  ;;  %391 = vst [vmem:[#allocation2 + $0x30] sm:$0xf0] %v388_v9  ;;  %v417_v14 = vpack.c.bf16 %v409_v13, %v407_v12 }
  0xc4   : > { %405 = vst [vmem:[#allocation2 + $0x40] sm:$0xf] %v402_v10  ;;  %475 = vmatprep.subr.bf16.mxu0 %v418_v11  ;;  %v598_v10 = vld [vmem:[%s284_s10] sm:$0xff] }
  0xc5   : > { %476 = vmatpush1.bf16.msra.mxu0 %v417_v14  ;;  %v412_v15 = vld [vmem:[#allocation2 + $0x28] sm:$0xff] }
  0xc6   : > { %v411_v19 = vld [vmem:[#allocation2 + $0x20] sm:$0xff] }
  0xc9   : > { %v414_v16 = vld [vmem:[#allocation2 + $0x38] sm:$0xff] }
  0xca   : > { %v416_v17 = vld [vmem:[#allocation2 + $0x48] sm:$0xf]  ;;  %v420_v18 = vpack.c.bf16 %v414_v16, %v412_v15  ;;  %v413_v20 = vld [vmem:[#allocation2 + $0x30] sm:$0xff] }
  0xcb   : > { %v422_v21 = vpack.c.bf16 %v416_v17, %v416_v17  ;;  %v415_v22 = vld [vmem:[#allocation2 + $0x40] sm:$0xf]  ;;  %v419_v23 = vpack.c.bf16 %v413_v20, %v411_v19 }
  0xcc   : > { %v421_v24 = vpack.c.bf16 %v415_v22, %v415_v22  ;;  %477 = vmatprep.subr.bf16.mxu0 %v420_v18 }
  0xcd   : > { %478 = vmatpush1.bf16.msra.mxu0 %v419_v23 }
  0xce   : > { %727 = vmatprep.subr.msk.bf16.mxu0 %vm468_vm10, %v422_v21  ;;  %v470_v25 = vsel %vm468_vm10, %v421_v24, 0 }
  0xd0   : > { %v434_v28 = vpop.permute.xlu0 %433 }
  0xd1   : > { %480 = vmatpush1.bf16.msra.mxu0 %v470_v25  ;;  %v439_v32 = vpop.permute.xlu1 %438 }
  0xd4   : > { %728 = vmatmul.mubr.msk.bf16.vlgmr.msra.gmra.mrb[0].mxu0 %vm461_vm11, %v842_v26  ;;  %v449_v48 = vpop.permute.xlu0 %448 }
  0xd5   : > { %517 = vmatprep.mubr.bf16.mxu0 %v955_v35  ;;  %v444_v44 = vpop.permute.xlu1 %443 }
  0xd9   : > { %v545_v61 = vpop.permute.xlu1 %544 }
  0xdc   : > { %729 = vmatmul.mubr.msk.bf16.gmra.mrb[4].mxu0 %vm461_vm11, %v843_v27 }
 0x1a7   : > { %v509_v29 = vpop.f32.mrb[0].mxu0 }
 0x1a8   : > { %v510_v30 = vadd.f32 %v509_v29, %v434_v28  ;;  %v511_v31 = vpop.f32.mrb[1].mxu0 }
 0x1a9   : > { %v512_v33 = vadd.f32 %v511_v31, %v434_v28  ;;  %v513_v34 = vpop.f32.mrb[2].mxu0 }
 0x1aa   : > { %v514_v36 = vadd.f32 %v513_v34, %v439_v32  ;;  %v515_v37 = vpop.f32.mrb[3].mxu0  ;;  %v528_v39 = vmax.f32 %v510_v30, 0.0 }
 0x1ab   : > { %v516_v38 = vadd.f32 %v515_v37, %v439_v32  ;;  %v529_v41 = vmax.f32 %v512_v33, 0.0 }
 0x1ac   : > { %v530_v40 = vmax.f32 %v514_v36, 0.0 }
 0x1ad   : > { %v531_v42 = vmax.f32 %v516_v38, 0.0 }
 0x1ae   : > { %v537_v43 = vpack.c.bf16 %v530_v40, %v528_v39 }
 0x1af   : > { %v519_v45 = vpop.f32.mrb[4].mxu0  ;;  %v538_v35 = vpack.c.bf16 %v531_v42, %v529_v41 }
 0x1b0   : > { %v520_v46 = vadd.f32 %v519_v45, %v444_v44  ;;  %v521_v47 = vpop.f32.mrb[5].mxu0 }
 0x1b1   : > { %v522_v49 = vadd.f32 %v521_v47, %v444_v44  ;;  %v523_v50 = vpop.f32.mrb[6].mxu0  ;;  %551 = vmatprep.subr.bf16.mxu1 %v538_v35 }
 0x1b2   : > { %v524_v51 = vadd.f32 %v523_v50, %v449_v48  ;;  %v525_v52 = vpop.f32.mrb[7].mxu0  ;;  %552 = vmatpush1.bf16.msra.mxu1 %v537_v43  ;;  %v532_v54 = vmax.f32 %v520_v46, 0.0 }
 0x1b3   : > { %v526_v53 = vadd.f32 %v525_v52, %v449_v48  ;;  %v533_v56 = vmax.f32 %v522_v49, 0.0 }
 0x1b4   : > { %v534_v55 = vmax.f32 %v524_v51, 0.0 }
 0x1b5   : > { %v535_v57 = vmax.f32 %v526_v53, 0.0 }
 0x1b6   : > { %v539_v58 = vpack.c.bf16 %v534_v55, %v532_v54 }
 0x1b7   : > { %v540_v59 = vpack.c.bf16 %v535_v57, %v533_v56 }
 0x1b9   : > { %553 = vmatprep.subr.bf16.mxu1 %v540_v59 }
 0x1ba   : > { %554 = vmatpush1.bf16.msra.mxu1 %v539_v58 }
 0x1bd   : > { %730 = vmatmul.mubr.msk.bf16.vlgmr.msra.gmra.mrb[0].mxu1 %vm547_vm12, %v536_v60 }
 0x290   : > { %v585_v62 = vpop.f32.mrb[0].mxu1 }
 0x291   : > { %v586_v63 = vadd.f32 %v585_v62, %v545_v61  ;;  %v587_v0 = vpop.f32.mrb[1].mxu1 }
 0x292   : > { %v588_v1 = vadd.f32 %v587_v0, %v545_v61  ;;  %v589_v2 = vpop.f32.mrb[2].mxu1 }
 0x293   : > { %v592_v3 = vmul.f32 0.5, %v586_v63  ;;  %v590_v4 = vpop.f32.mrb[3].mxu1 }
 0x294   : > { %v593_v5 = vmul.f32 0.5, %v588_v1 }
 0x295   : > { %v594_v6 = vmul.f32 1.442695, %v592_v3 }
 0x296   : > { %v596_v7 = vmul.f32 1.442695, %v593_v5 }
 0x297   : > { %844 = vpow2.f32 %v594_v6 }
 0x298   : > { %846 = vpow2.f32 %v596_v7 }
 0x2a1   : > { %v845_v8 = vpop.eup %844 }
 0x2a2   : > { %v847_v9 = vpop.eup %846 }
 0x2a3   : > { %v601_v11 = vcombine.high %v845_v8, %v847_v9 }
 0x2a5   : > { %v603_v12 = vmul.f32 %v601_v11, %v598_v10 }
 0x2a7   : > { %v605_v13 = vcombine.high %v603_v12, %v603_v12  ;;  %v607_v14 = vadd.f32 %v603_v12, %v586_v63 }
 0x2a9   : > { %v608_v15 = vadd.f32 %v605_v13, %v588_v1 }
 0x2ab   : > { %v611_v16 = vcombine.low %v607_v14, %v608_v15 }
 0x2ad   : > { %615 = vst.msk [vmem:[%s274_s11] sm:$0xff] %vm614_vm14, %v611_v16 }
 0x2ae   : > { %889 = shalt.err (!%p886_p7)
}
 0x2af   : > { %s890_s28 = scalar_lea.hbm %s1125_s17, 128  ;;  %s894_s12 = scalar_lea.hbm %s1173_s6, 512 }
 0x2b0   : > { %p891_p8 = scmp.ne.s32.totalorder %s1125_s17, %s890_s28  ;;  %p895_p1 = scmp.lt.u32.totalorder %s1125_s17, %s1173_s6 }
 0x2b1   : > { %p896_p0 = scmp.lt.u32.totalorder %s894_s12, %s890_s28  ;;  %p898_p6 = scmp.lt.u32.totalorder %s890_s28, %s1125_s17 }
 0x2b2   : > { %p892_p11 = pnand %p891_p8, %p1184_p9 }
 0x2b3   : > { %p897_p5 = por %p896_p0, %p895_p1 }
 0x2b4   : > { %p893_p13 = pneg %p892_p11 }
 0x2b5   : > { %p899_p10 = por %p898_p6, %p897_p5 }
 0x2b7   : > { %p900_p12 = pnand %p899_p10, %p893_p13 }
 0x2b9   : > { %903 = shalt.err (!%p900_p12)
}
 0x2ba   : > { %743 = dma.vmem_to_hbm [thread:$0]  (%p1184_p9), %s1127_s9, 128, %s1125_s17, %s617_s18  }
 0x2bb PF: > { %p755_p2 = scmp.ge.s32.totalorder %s942_s24, 2  ;;  %s643_s11 = sand.u32 1, %s930_s21  }
 0x2bc   : > { %p1185_p3 = scmp.ne.s32.totalorder %s1178_s8, 0  ;;  %s644_s13 = scalar_lea.sflag [#allocation5], %s643_s11 }
 0x2be   : > { %p750_p4 = pnand %p755_p2, %p1185_p3 }
 0x2c0   : > { %925 = dma.done.wait (!%p750_p4), %s644_s13, 128  }
 0x2c1   : > { %927 = vsyncadd (!%p750_p4), %s644_s13, 4294967168  ;;  %p17_p7 = scmp.ge.s32.totalorder %s1017_s27, 6   ;;  %s1186_s21 = smov %s934_s22 }
 0x2c2   : > { %s1187_s22 = smov %s938_s23  ;;  %s1188_s23 = smov %s1028_s30 }
 0x2c3   : > { %s1189_s24 = smov %s1017_s27  ;;  %19 = sbr.rel (!%p17_p7) target bundleno = 4 (0x4), region = 87 }
 0x2ca   :  { %649 = vsyncpa [#allocation4], 1 }
 0x2cb   :  { %651 = vsyncpa [#allocation4 + $0x1], 1 }
 0x2cc   :  { %652 = vsyncpa [#allocation5], 1 }
 0x2cd   :  { %654 = vsyncpa [#allocation5 + $0x1], 1 }

</bundles_post_ra>
